<compile_context>
chip_gen: v6e
topology: v6e:2x2x1
jax: 0.10.0
libtpu: 0.0.40
codegen_flags: <defaults>
</compile_context>

<pallas_src>
import functools

import jax
import jax.numpy as jnp
from jax import lax
from jax.experimental import pallas as pl
from jax.experimental.pallas import tpu as pltpu


def _round_up(x: int, m: int) -> int:
    return ((x + m - 1) // m) * m


def _mel_kernel(logits_ref, targets_ref, loss_ref, *, margin, num_classes,
                transpose_in_kernel):
    """Per-tile maximal-entropy loss, computed in a lane-dense (C, T) layout.

    logits_ref : (T, C) native layout     (transpose_in_kernel=True)
                 (C, T) pre-transposed    (fallback path)
    targets_ref: (1, T) int32
    loss_ref   : (1, T) float32  per-sample loss (lane-dense store)
    """
    x = logits_ref[...].astype(jnp.float32)
    if transpose_in_kernel:
        # (T, C) -> (C, T): classes on sublanes, samples on lanes.  The XLU
        # transpose of a 22-lane tile is cheap and hides under the HBM DMA;
        # all subsequent VPU/EUP work runs on ~C/128 of the vregs it would
        # need in the (T, C) layout.
        x = jnp.transpose(x)
    tgt = targets_ref[...]                                   # (1, T) int32

    c, t = x.shape
    cls = lax.broadcasted_iota(jnp.int32, (c, t), 0)         # class id per sublane
    is_pos = tgt >= 0                                        # (1, T) known vs unknown
    onehot = cls == tgt                                      # (C, T) bool; all-False for unknowns

    # margin logits: subtract margin only at the target class of known samples.
    mlogits = jnp.where(onehot, x - jnp.float32(margin), x)  # (C, T)

    # numerically stable log-sum-exp over the class (sublane) axis
    m = jnp.max(mlogits, axis=0, keepdims=True)              # (1, T)
    lse = jnp.log(jnp.sum(jnp.exp(mlogits - m), axis=0, keepdims=True)) + m

    # closed form of sum_c (-log_softmax(mlogits))_c * cat_c :
    #   known   (cat = one-hot): lse - (logits[target] - margin)
    #   unknown (cat = 1/C)    : lse - mean_c(logits)          (mlogits == logits)
    tgt_term = jnp.sum(jnp.where(onehot, mlogits, 0.0), axis=0, keepdims=True)
    mean_term = jnp.sum(mlogits, axis=0, keepdims=True) * jnp.float32(1.0 / num_classes)
    loss_ref[...] = lse - jnp.where(is_pos, tgt_term, mean_term)


def _per_sample_call(logits, targets_row, *, margin, num_classes, tile_n,
                     transpose_in_kernel):
    """Tiled pallas_call; returns (1, n_pad) per-sample losses (pad lanes garbage)."""
    if transpose_in_kernel:
        n, c = logits.shape
        logits_spec = pl.BlockSpec((tile_n, c), lambda i: (i, 0))   # native (N, C) slab
    else:
        c, n = logits.shape
        logits_spec = pl.BlockSpec((c, tile_n), lambda i: (0, i))   # pre-transposed (C, N)

    grid = pl.cdiv(n, tile_n)            # ragged last block reads OOB; pad lanes discarded
    n_pad = grid * tile_n

    kernel = functools.partial(_mel_kernel, margin=float(margin),
                               num_classes=num_classes,
                               transpose_in_kernel=transpose_in_kernel)

    return pl.pallas_call(
        kernel,
        out_shape=jax.ShapeDtypeStruct((1, n_pad), jnp.float32),
        grid=(grid,),
        in_specs=[logits_spec,
                  pl.BlockSpec((1, tile_n), lambda i: (0, i))],     # targets row
        out_specs=pl.BlockSpec((1, tile_n), lambda i: (0, i)),       # lane-dense losses
        compiler_params=pltpu.CompilerParams(
            dimension_semantics=("parallel",),    # shardable across v7x's 2 TCs
            vmem_limit_bytes=32 * 1024 * 1024,    # v7x-safe scoped VMEM
        ),
    )(logits, targets_row)


@functools.lru_cache(maxsize=None)
def _in_kernel_transpose_supported(num_classes: int, dtype_str: str) -> bool:
    """One-time feature probe: does Mosaic lower the in-kernel (T,C)->(C,T) transpose?"""
    try:
        x = jnp.zeros((256, num_classes), dtype=dtype_str)
        t = jnp.zeros((1, 256), jnp.int32)
        out = _per_sample_call(x, t, margin=0.0, num_classes=num_classes,
                               tile_n=128, transpose_in_kernel=True)
        jax.block_until_ready(out)
        return True
    except Exception:
        return False


def maximal_entropy_loss(logits, targets, *, margin, num_classes,
                         reduction="mean", weight=None, max_tile_n=8192):
    """JAX/Pallas equivalent of MaximalEntropyLoss.forward.

    logits : (N, C) float (any float dtype; cast to f32 inside the kernel)
    targets: (N,)   int   (negative values mark unknown / negative samples)
    """
    n, c = logits.shape
    assert c == num_classes

    # PyTorch quirk: 21-way heads use 1-based labels
    if c == 21:
        targets = targets - 1
    targets_row = targets.astype(jnp.int32).reshape(1, n)

    # Sample tile: lane-aligned (multiple of 128), large enough to amortize the
    # ~0.35 us per-grid-step overhead, capped so the lane-padded (tile, C) VMEM
    # block (tile*512 B per buffer) plus f32 intermediates stay well under the
    # 32 MiB scoped VMEM (v7x-safe), and chosen so the grid has >= 2 parallel
    # steps whenever possible (both v7x TensorCores busy).
    tile_n = max(128, min(max_tile_n, _round_up(pl.cdiv(n, 2), 128)))

    if _in_kernel_transpose_supported(c, str(logits.dtype)):
        per_sample = _per_sample_call(
            logits, targets_row, margin=margin, num_classes=c,
            tile_n=tile_n, transpose_in_kernel=True)
    else:
        # TODO(synk): fallback costs one extra HBM read+write pass for the
        # XLA-side transpose; only used if Mosaic rejects the in-kernel one.
        per_sample = _per_sample_call(
            jnp.transpose(logits), targets_row, margin=margin, num_classes=c,
            tile_n=tile_n, transpose_in_kernel=False)

    loss = per_sample[0, :n]                                   # drop pad-lane garbage

    # glue: optional weight multiply + reduction (trivial, done in plain JAX)
    if weight is not None:
        loss = loss * weight
    if reduction == "mean":
        return jnp.mean(loss)
    elif reduction == "sum":
        return jnp.sum(loss)
    else:
        return loss


def _reference_loss(logits, targets, margin, num_classes,
                    reduction="mean", weight=None):
    """Pure-JAX reference mirroring the PyTorch forward."""
    logits = logits.astype(jnp.float32)
    if logits.shape[1] == 21:
        targets = targets - 1
    pos = targets >= 0                                          # (N,)
    eye = jnp.eye(num_classes, dtype=jnp.float32)
    onehot = jnp.where(pos[:, None],
                       eye[jnp.clip(targets, 0, num_classes - 1)], 0.0)
    cat = jnp.where(pos[:, None], onehot, 1.0 / num_classes)
    margin_logits = logits - margin * onehot
    neg_logp = -jax.nn.log_softmax(margin_logits, axis=1)
    loss = jnp.sum(neg_logp * cat, axis=1)
    if weight is not None:
        loss = loss * weight
    if reduction == "mean":
        return jnp.mean(loss)
    elif reduction == "sum":
        return jnp.sum(loss)
    return loss


if __name__ == "__main__":
    key = jax.random.PRNGKey(0)
    num_classes = 22       # e.g. thumos: background + 21 actions
    margin = 1.0
    batch, seq = 2, 8
    n = batch * seq        # 16 frames (small demo shape)

    k1, k2 = jax.random.split(key)
    logits = jax.random.normal(k1, (n, num_classes), dtype=jnp.float32)
    # include negative targets so both the known and unknown branches are exercised
    targets = jax.random.randint(k2, (n,), -1, num_classes, dtype=jnp.int32)

    loss = maximal_entropy_loss(logits, targets, margin=margin,
                                num_classes=num_classes, reduction="mean")
    loss = jax.block_until_ready(loss)
    ref = _reference_loss(logits, targets, margin, num_classes, reduction="mean")
    assert jnp.allclose(loss, ref, rtol=1e-5, atol=1e-5), (loss, ref)

    # also exercise the unreduced path
    loss_none = maximal_entropy_loss(logits, targets, margin=margin,
                                     num_classes=num_classes, reduction="none")
    jax.block_until_ready(loss_none)
    ref_none = _reference_loss(logits, targets, margin, num_classes, reduction="none")
    assert jnp.allclose(loss_none, ref_none, rtol=1e-5, atol=1e-5)

    print("KERNEL_OK")
</pallas_src>

<mosaic_0001>
module attributes {stable_mosaic.version = 11 : i64} {
  func.func @_mel_kernel(%arg0: i32, %arg1: memref<128x22xf32, #tpu.memory_space<vmem>>, %arg2: memref<1x128xi32, #tpu.memory_space<vmem>>, %arg3: memref<1x128xf32, #tpu.memory_space<vmem>>) attributes {dimension_semantics = [#tpu.dimension_semantics<parallel>], iteration_bounds = array<i64: 2>, scalar_prefetch = 0 : i64, scratch_operands = 0 : i64, tpu.core_type = #tpu.core_type<tc>, window_params = [{transform_indices = @transform_0, window_bounds = array<i64: 128, 22>}, {transform_indices = @transform_1, window_bounds = array<i64: 1, 128>}, {transform_indices = @transform_2, window_bounds = array<i64: 1, 128>}]} {
    %c0 = arith.constant 0 : index
    %c0_0 = arith.constant 0 : index
    %0 = vector.load %arg1[%c0, %c0_0] : memref<128x22xf32, #tpu.memory_space<vmem>>, vector<128x22xf32>
    %1 = tpu.transpose %0, [1, 0] : vector<128x22xf32> -> vector<22x128xf32>
    %c0_1 = arith.constant 0 : index
    %c0_2 = arith.constant 0 : index
    %2 = vector.load %arg2[%c0_1, %c0_2] : memref<1x128xi32, #tpu.memory_space<vmem>>, vector<1x128xi32>
    %3 = tpu.iota {dimensions = array<i32: 0>} : vector<22x128xi32>
    %c0_i32 = arith.constant 0 : i32
    %4 = vector.broadcast %c0_i32 : i32 to vector<1x128xi32>
    %5 = arith.cmpi sge, %2, %4 : vector<1x128xi32>
    %6 = vector.broadcast %2 : vector<1x128xi32> to vector<22x128xi32>
    %7 = arith.cmpi eq, %3, %6 : vector<22x128xi32>
    %cst = arith.constant 0.000000e+00 : f32
    %8 = vector.broadcast %cst : f32 to vector<22x128xf32>
    %9 = arith.subf %1, %8 : vector<22x128xf32>
    %10 = arith.select %7, %9, %1 : vector<22x128xi1>, vector<22x128xf32>
    %cst_3 = arith.constant dense<0xFF800000> : vector<128xf32>
    %11 = vector.multi_reduction <maximumf>, %10, %cst_3 [0] : vector<22x128xf32> to vector<128xf32>
    %12 = vector.shape_cast %11 : vector<128xf32> to vector<1x128xf32>
    %13 = vector.broadcast %12 : vector<1x128xf32> to vector<22x128xf32>
    %14 = arith.subf %10, %13 : vector<22x128xf32>
    %15 = math.exp %14 : vector<22x128xf32>
    %cst_4 = arith.constant dense<0.000000e+00> : vector<128xf32>
    %16 = vector.multi_reduction <add>, %15, %cst_4 [0] : vector<22x128xf32> to vector<128xf32>
    %17 = vector.shape_cast %16 : vector<128xf32> to vector<1x128xf32>
    %18 = math.log %17 : vector<1x128xf32>
    %19 = arith.addf %18, %12 : vector<1x128xf32>
    %cst_5 = arith.constant 0.000000e+00 : f32
    %20 = vector.broadcast %cst_5 : f32 to vector<22x128xf32>
    %21 = arith.select %7, %10, %20 : vector<22x128xi1>, vector<22x128xf32>
    %cst_6 = arith.constant dense<0.000000e+00> : vector<128xf32>
    %22 = vector.multi_reduction <add>, %21, %cst_6 [0] : vector<22x128xf32> to vector<128xf32>
    %23 = vector.shape_cast %22 : vector<128xf32> to vector<1x128xf32>
    %cst_7 = arith.constant dense<0.000000e+00> : vector<128xf32>
    %24 = vector.multi_reduction <add>, %10, %cst_7 [0] : vector<22x128xf32> to vector<128xf32>
    %25 = vector.shape_cast %24 : vector<128xf32> to vector<1x128xf32>
    %cst_8 = arith.constant 0.0454545468 : f32
    %26 = vector.broadcast %cst_8 : f32 to vector<1x128xf32>
    %27 = arith.mulf %25, %26 : vector<1x128xf32>
    %28 = arith.select %5, %23, %27 : vector<1x128xi1>, vector<1x128xf32>
    %29 = arith.subf %19, %28 : vector<1x128xf32>
    %c0_9 = arith.constant 0 : index
    %c0_10 = arith.constant 0 : index
    %30 = vector.load %arg3[%c0_9, %c0_10] : memref<1x128xf32, #tpu.memory_space<vmem>>, vector<1x128xf32>
    tpu.vector_store %arg3[%c0_9, %c0_10], %29 {strides = array<i32>} : memref<1x128xf32, #tpu.memory_space<vmem>>, vector<1x128xf32>,
    return
  }
  func.func @transform_0(%arg0: i32) -> (i32, i32) {
    %c0_i32 = arith.constant 0 : i32
    %c0_i32_0 = arith.constant 0 : i32
    return %arg0, %c0_i32 : i32, i32
  }
  func.func @transform_1(%arg0: i32) -> (i32, i32) {
    %c0_i32 = arith.constant 0 : i32
    %c0_i32_0 = arith.constant 0 : i32
    return %c0_i32, %arg0 : i32, i32
  }
  func.func @transform_2(%arg0: i32) -> (i32, i32) {
    %c0_i32 = arith.constant 0 : i32
    %c0_i32_0 = arith.constant 0 : i32
    return %c0_i32, %arg0 : i32, i32
  }
}

module attributes {stable_mosaic.version = 11 : i64} {
  func.func @_mel_kernel(%arg0: i32, %arg1: memref<22x128xf32, #tpu.memory_space<vmem>>, %arg2: memref<1x128xi32, #tpu.memory_space<vmem>>, %arg3: memref<1x128xf32, #tpu.memory_space<vmem>>) attributes {dimension_semantics = [#tpu.dimension_semantics<parallel>], iteration_bounds = array<i64: 1>, scalar_prefetch = 0 : i64, scratch_operands = 0 : i64, tpu.core_type = #tpu.core_type<tc>, window_params = [{transform_indices = @transform_0, window_bounds = array<i64: 22, 128>}, {transform_indices = @transform_1, window_bounds = array<i64: 1, 128>}, {transform_indices = @transform_2, window_bounds = array<i64: 1, 128>}]} {
    %c0 = arith.constant 0 : index
    %c0_0 = arith.constant 0 : index
    %0 = vector.load %arg1[%c0, %c0_0] : memref<22x128xf32, #tpu.memory_space<vmem>>, vector<22x128xf32>
    %c0_1 = arith.constant 0 : index
    %c0_2 = arith.constant 0 : index
    %1 = vector.load %arg2[%c0_1, %c0_2] : memref<1x128xi32, #tpu.memory_space<vmem>>, vector<1x128xi32>
    %2 = tpu.iota {dimensions = array<i32: 0>} : vector<22x128xi32>
    %c0_i32 = arith.constant 0 : i32
    %3 = vector.broadcast %c0_i32 : i32 to vector<1x128xi32>
    %4 = arith.cmpi sge, %1, %3 : vector<1x128xi32>
    %5 = vector.broadcast %1 : vector<1x128xi32> to vector<22x128xi32>
    %6 = arith.cmpi eq, %2, %5 : vector<22x128xi32>
    %cst = arith.constant 1.000000e+00 : f32
    %7 = vector.broadcast %cst : f32 to vector<22x128xf32>
    %8 = arith.subf %0, %7 : vector<22x128xf32>
    %9 = arith.select %6, %8, %0 : vector<22x128xi1>, vector<22x128xf32>
    %cst_3 = arith.constant dense<0xFF800000> : vector<128xf32>
    %10 = vector.multi_reduction <maximumf>, %9, %cst_3 [0] : vector<22x128xf32> to vector<128xf32>
    %11 = vector.shape_cast %10 : vector<128xf32> to vector<1x128xf32>
    %12 = vector.broadcast %11 : vector<1x128xf32> to vector<22x128xf32>
    %13 = arith.subf %9, %12 : vector<22x128xf32>
    %14 = math.exp %13 : vector<22x128xf32>
    %cst_4 = arith.constant dense<0.000000e+00> : vector<128xf32>
    %15 = vector.multi_reduction <add>, %14, %cst_4 [0] : vector<22x128xf32> to vector<128xf32>
    %16 = vector.shape_cast %15 : vector<128xf32> to vector<1x128xf32>
    %17 = math.log %16 : vector<1x128xf32>
    %18 = arith.addf %17, %11 : vector<1x128xf32>
    %cst_5 = arith.constant 0.000000e+00 : f32
    %19 = vector.broadcast %cst_5 : f32 to vector<22x128xf32>
    %20 = arith.select %6, %9, %19 : vector<22x128xi1>, vector<22x128xf32>
    %cst_6 = arith.constant dense<0.000000e+00> : vector<128xf32>
    %21 = vector.multi_reduction <add>, %20, %cst_6 [0] : vector<22x128xf32> to vector<128xf32>
    %22 = vector.shape_cast %21 : vector<128xf32> to vector<1x128xf32>
    %cst_7 = arith.constant dense<0.000000e+00> : vector<128xf32>
    %23 = vector.multi_reduction <add>, %9, %cst_7 [0] : vector<22x128xf32> to vector<128xf32>
    %24 = vector.shape_cast %23 : vector<128xf32> to vector<1x128xf32>
    %cst_8 = arith.constant 0.0454545468 : f32
    %25 = vector.broadcast %cst_8 : f32 to vector<1x128xf32>
    %26 = arith.mulf %24, %25 : vector<1x128xf32>
    %27 = arith.select %4, %22, %26 : vector<1x128xi1>, vector<1x128xf32>
    %28 = arith.subf %18, %27 : vector<1x128xf32>
    %c0_9 = arith.constant 0 : index
    %c0_10 = arith.constant 0 : index
    %29 = vector.load %arg3[%c0_9, %c0_10] : memref<1x128xf32, #tpu.memory_space<vmem>>, vector<1x128xf32>
    tpu.vector_store %arg3[%c0_9, %c0_10], %28 {strides = array<i32>} : memref<1x128xf32, #tpu.memory_space<vmem>>, vector<1x128xf32>,
    return
  }
  func.func @transform_0(%arg0: i32) -> (i32, i32) {
    %c0_i32 = arith.constant 0 : i32
    %c0_i32_0 = arith.constant 0 : i32
    return %c0_i32, %arg0 : i32, i32
  }
  func.func @transform_1(%arg0: i32) -> (i32, i32) {
    %c0_i32 = arith.constant 0 : i32
    %c0_i32_0 = arith.constant 0 : i32
    return %c0_i32, %arg0 : i32, i32
  }
  func.func @transform_2(%arg0: i32) -> (i32, i32) {
    %c0_i32 = arith.constant 0 : i32
    %c0_i32_0 = arith.constant 0 : i32
    return %c0_i32, %arg0 : i32, i32
  }
}

</mosaic_0001>

<bundles_post_ra>
// kernel: tpu_custom_call.1
= control target key start
LH: loop header
LB: loop body
LE: loop exit
PB: predicated region body
PF: predicated region fallthrough
CT: control target
= control target key end

     0   :  { %7 = vsyncpa [#allocation3], 0  ;;  %s608_s0 = inlined_call_operand.vmem [shape: f32[256,22], index: 0, kind: input, shape index: {}]   ;;  %s609_s1 = inlined_call_operand.vmem [shape: s32[1,256], index: 1, kind: input, shape index: {}]   ;;  %s610_s2 = inlined_call_operand.hbm [shape: f32[1,256], index: 2, kind: output, shape index: {}]  }
   0x1   :  { %9 = vsyncpa [#allocation3 + $0x1], 0  ;;  %s485_s9 = smov 0   ;;  %s487_s10 = smov 0  }
   0x2   :  { %s489_s11 = smov 0   ;;  %s491_s12 = smov 0  }
   0x3 LB: > { %s506_s13 = sadd.s32 4294967295, %s467_s12   ;;  %s351_s14 = sadd.s32 4294967294, %s467_s12   ;;  %s467_s12 = sphi %s491_s12, %s616_s12   ;;  %s463_s11 = sphi %s489_s11, %s615_s11   ;;  %s459_s10 = sphi %s487_s10, %s614_s10   ;;  %s455_s9 = sphi %s485_s9, %s613_s9  }
   0x4   : > { %s510_s15 = sadd.s32 1, %s467_s12   ;;  %s74_s16 = sadd.s32 1, %s463_s11 }
   0x5   : > { %s71_s17 = ssub.s32 %s467_s12, %s510_s15  ;;  %p84_p0 = scmp.ne.s32.totalorder %s463_s11, %s459_s10 }
   0x6   : > { %p72_p1 = scmp.eq.s32.totalorder %s71_s17, 0  ;;  %p85_p2 = scmp.eq.s32.totalorder %s506_s13, 1 }
   0x7   : > { %p90_p3 = scmp.ne.s32.totalorder %s459_s10, %s455_s9  ;;  %p91_p4 = scmp.eq.s32.totalorder %s351_s14, 1 }
   0x8   : > { %s521_s18 = scalar_select %p72_p1, %s463_s11, %s74_s16  }
   0x9   : > { %p523_p5 = por %p85_p2, %p84_p0  ;;  %p527_p6 = por %p91_p4, %p90_p3 }
   0xa   : > { %p354_p7 = scmp.ge.s32.totalorder %s467_s12, 1  ;;  %p124_p8 = scmp.lt.s32.totalorder %s467_s12, 3 }
   0xc   : > { %p125_p9 = pnand %p354_p7, %p124_p8 }
   0xd   : > { %s534_s21 = sshll.u32 (!%p125_p9), %s506_s13, 4  ;;  %p154_p11 = scmp.lt.s32.totalorder (!%p125_p9), %s506_s13, 1 }
   0xe   : > { %128 = sbr.rel (%p125_p9) target bundleno = 240 (0xf0), region = 28  ;;  %p149_p10 = scmp.lt.s32.totalorder (!%p125_p9), %s534_s21, 31 }
   0xf   : > { %s146_s30 = sand.u32 (!%p125_p9), 1, %s459_s10   ;;  %s285_s7 = scalar_lea.hbm (!%p125_p9), %s610_s2, %s534_s21 }
  0x10   : > { %s147_s3 = scalar_lea.vmem (!%p125_p9), [#allocation2], %s146_s30  ;;  %s275_s8 = scalar_lea.sflag (!%p125_p9), [#allocation3], %s146_s30 }
  0x11   : > { %s287_s4 = sshll.u32 (!%p125_p9), %s147_s3, 4  ;;  %s469_s14 = smov (!%p125_p9), [#allocation2]   ;;  %s288_s4 = int_to_ptr.vmem [resolvable:$true] %s287_s4 }
  0x12   : > { %s411_s16 = sshll.u32 (!%p125_p9), %s469_s14, 4  ;;  %s412_s16 = int_to_ptr.vmem [resolvable:$false] %s411_s16 }
  0x13   : > { %s150_s22 = scalar_select %p149_p10, %s534_s21, 31  ;;  %vm218_vm0 = vcmask 1045504   ;;  %v206_v31 = vlaneseq }
  0x14   : > { %s618_s13 = smov (!%p154_p11, %s506_s13), 1  ;;  %s413_s17 = scalar_lea.vmem %s412_s16, 32 }
  0x15   : > { %s356_s23 = sshll.u32 %s150_s22, 3  ;;  %v207_v35 = vshrl.u32 %v206_v31, 7  ;;  %s156_s29 = scalar_lea.vmem %s609_s1, %s618_s13 }
  0x16   : > { %s541_s26 = scalar_lea.vmem %s608_s0, %s356_s23  ;;  %v205_v37 = vld [vmem:[%s156_s29] sm:$0x1]  ;;  %s407_s13 = scalar_lea.vmem %s288_s4, 16 }
  0x17   : > { %v157_v0 = vld [vmem:[%s541_s26] sm:$0xff]  ;;  %v158_v1 = vld [vmem:[%s541_s26 + $0x8] sm:$0xff]  ;;  %v159_v2 = vld [vmem:[%s541_s26 + $0x10] sm:$0xff]  ;;  %v213_v36 = vsub.s32 0, %v207_v35  ;;  %v209_v38 = vadd.s32 16, %v207_v35  ;;  %v208_v39 = vadd.s32 8, %v207_v35  ;;  %p408_p12 = scmp.ne.s32.totalorder %s288_s4, %s407_s13  ;;  %p414_p1 = scmp.lt.s32.totalorder %s288_s4, %s412_s16 }
  0x18   : > { %173 = vxpose.xlu0.b32.start [1/16] (narrow) %v157_v0, 24  ;;  %v160_v3 = vld [vmem:[%s541_s26 + $0x18] sm:$0xff]  ;;  %v161_v4 = vld [vmem:[%s541_s26 + $0x20] sm:$0xff]  ;;  %v162_v5 = vld [vmem:[%s541_s26 + $0x28] sm:$0xff]  ;;  %vm210_vm4 = vcmp.ge.s32.totalorder %v205_v37, 0  ;;  %p415_p2 = scmp.lt.s32.totalorder %s413_s17, %s407_s13 }
  0x19   : > { %v163_v6 = vld [vmem:[%s541_s26 + $0x30] sm:$0xff]  ;;  %v164_v7 = vld [vmem:[%s541_s26 + $0x38] sm:$0xff]  ;;  %v165_v8 = vld [vmem:[%s541_s26 + $0x40] sm:$0xff]  ;;  %v214_v40 = vrot.slane %v205_v37, %v213_v36  ;;  %p409_p13 = pnand %p408_p12, %p523_p5 }
  0x1a   : > { %v166_v9 = vld [vmem:[%s541_s26 + $0x48] sm:$0xff]  ;;  %v167_v10 = vld [vmem:[%s541_s26 + $0x50] sm:$0xff]  ;;  %v168_v11 = vld [vmem:[%s541_s26 + $0x58] sm:$0xff]  ;;  %p416_p3 = por %p415_p2, %p414_p1 }
  0x1b   : > { %v169_v12 = vld [vmem:[%s541_s26 + $0x60] sm:$0xff]  ;;  %v170_v13 = vld [vmem:[%s541_s26 + $0x68] sm:$0xff]  ;;  %v171_v14 = vld [vmem:[%s541_s26 + $0x70] sm:$0xff]  ;;  %vm217_vm1 = vcmp.eq.s32.totalorder %v209_v38, %v214_v40  ;;  %vm216_vm2 = vcmp.eq.s32.totalorder %v208_v39, %v214_v40  ;;  %vm215_vm3 = vcmp.eq.s32.totalorder %v207_v35, %v214_v40  ;;  %p410_p0 = pneg %p409_p13 }
  0x1c   : > { %174 = vxpose.xlu0.b32.cont [2/16] (narrow) %v158_v1, 24  ;;  %v172_v15 = vld [vmem:[%s541_s26 + $0x78] sm:$0xff] }
  0x1d   : > { %p417_p4 = pnand %p416_p3, %p410_p0 }
  0x20   : > { %175 = vxpose.xlu0.b32.cont [3/16] (narrow) %v159_v2, 24 }
  0x24   : > { %176 = vxpose.xlu0.b32.cont [4/16] (narrow) %v160_v3, 24 }
  0x28   : > { %177 = vxpose.xlu0.b32.cont [5/16] (narrow) %v161_v4, 24 }
  0x2c   : > { %178 = vxpose.xlu0.b32.cont [6/16] (narrow) %v162_v5, 24 }
  0x30   : > { %179 = vxpose.xlu0.b32.cont [7/16] (narrow) %v163_v6, 24 }
  0x34   : > { %180 = vxpose.xlu0.b32.cont [8/16] (narrow) %v164_v7, 24 }
  0x38   : > { %181 = vxpose.xlu0.b32.cont [9/16] (narrow) %v165_v8, 24 }
  0x3c   : > { %182 = vxpose.xlu0.b32.cont [10/16] (narrow) %v166_v9, 24 }
  0x40   : > { %183 = vxpose.xlu0.b32.cont [11/16] (narrow) %v167_v10, 24 }
  0x44   : > { %184 = vxpose.xlu0.b32.cont [12/16] (narrow) %v168_v11, 24 }
  0x48   : > { %185 = vxpose.xlu0.b32.cont [13/16] (narrow) %v169_v12, 24 }
  0x4c   : > { %186 = vxpose.xlu0.b32.cont [14/16] (narrow) %v170_v13, 24 }
  0x50   : > { %187 = vxpose.xlu0.b32.cont [15/16] (narrow) %v171_v14, 24 }
  0x54   : > { %188 = vxpose.xlu0.b32.end [16/16] (narrow) %v172_v15, 24 }
  0x94   : > { %v189_v16 = vpop.trf.xlu0 }
  0x95   : > { %v249_v51 = vsel %vm215_vm3, %v189_v16, 0.0 }
  0x98   : > { %v190_v17 = vpop.trf.xlu0 }
  0x99   : > { %v220_v18 = vmax.f32 %v189_v16, %v190_v17  ;;  %v261_v44 = vadd.f32 %v190_v17, %v189_v16  ;;  %v250_v47 = vsel %vm216_vm2, %v190_v17, 0.0 }
  0x9a   : > { %v252_v54 = vadd.f32 %v250_v47, %v249_v51 }
  0x9c   : > { %v191_v19 = vpop.trf.xlu0 }
  0x9d   : > { %v219_v20 = vsel %vm218_vm0, %v191_v19, -inf  ;;  %v262_v42 = vsel %vm218_vm0, %v191_v19, 0.0  ;;  %v251_v45 = vsel %vm217_vm1, %v191_v19, 0.0 }
  0x9e   : > { %v221_v21 = vmax.f32 %v220_v18, %v219_v20  ;;  %v263_v50 = vadd.f32 %v262_v42, %v261_v44  ;;  %v253_v53 = vsel %vm218_vm0, %v251_v45, 0.0 }
  0x9f   : > { %v254_v56 = vadd.f32 %v253_v53, %v252_v54 }
  0xa0   : > { %v222_v22 = vrot.slane %v221_v21, 4  ;;  %v264_v57 = vrot.slane %v263_v50, 4 }
  0xa1   : > { %v255_v60 = vrot.slane %v254_v56, 4 }
  0xa2   : > { %v223_v23 = vmax.f32 %v221_v21, %v222_v22  ;;  %v265_v61 = vadd.f32 %v264_v57, %v263_v50 }
  0xa3   : > { %v256_v0 = vadd.f32 %v255_v60, %v254_v56 }
  0xa4   : > { %v224_v24 = vrot.slane %v223_v23, 2  ;;  %v266_v1 = vrot.slane %v265_v61, 2 }
  0xa5   : > { %v257_v3 = vrot.slane %v256_v0, 2 }
  0xa6   : > { %v225_v25 = vmax.f32 %v223_v23, %v224_v24  ;;  %v267_v4 = vadd.f32 %v266_v1, %v265_v61 }
  0xa7   : > { %v258_v5 = vadd.f32 %v257_v3, %v256_v0 }
  0xa8   : > { %v226_v26 = vrot.slane %v225_v25, 1  ;;  %v268_v6 = vrot.slane %v267_v4, 1 }
  0xa9   : > { %v259_v7 = vrot.slane %v258_v5, 1 }
  0xaa   : > { %v560_v27 = vmax.f32 %v225_v25, %v226_v26  ;;  %v269_v8 = vadd.f32 %v268_v6, %v267_v4 }
  0xab   : > { %v260_v10 = vadd.f32 %v259_v7, %v258_v5 }
  0xac   : > { %v228_v28 = vsub.f32 %v189_v16, %v560_v27  ;;  %v229_v29 = vsub.f32 %v190_v17, %v560_v27  ;;  %v230_v30 = vsub.f32 %v191_v19, %v560_v27  ;;  %v270_v11 = vmul.f32 0.045454547, %v269_v8 }
  0xae   : > { %v231_v32 = vmul.f32 1.442695, %v228_v28  ;;  %v233_v33 = vmul.f32 1.442695, %v229_v29  ;;  %v235_v34 = vmul.f32 1.442695, %v230_v30  ;;  %v271_v14 = vsel %vm210_vm4, %v260_v10, %v270_v11 }
  0xb0   : > { %399 = vpow2.f32 %v231_v32 }
  0xb1   : > { %401 = vpow2.f32 %v233_v33 }
  0xb2   : > { %403 = vpow2.f32 %v235_v34 }
  0xbd   : > { %v400_v41 = vpop.eup %399 }
  0xbe   : > { %v402_v43 = vpop.eup %401 }
  0xbf   : > { %v404_v46 = vpop.eup %403  ;;  %v237_v48 = vadd.f32 %v402_v43, %v400_v41 }
  0xc0   : > { %v238_v49 = vsel %vm218_vm0, %v404_v46, 0.0 }
  0xc1   : > { %v239_v52 = vadd.f32 %v238_v49, %v237_v48 }
  0xc3   : > { %v240_v55 = vrot.slane %v239_v52, 4 }
  0xc5   : > { %v241_v58 = vadd.f32 %v240_v55, %v239_v52 }
  0xc7   : > { %v242_v59 = vrot.slane %v241_v58, 2 }
  0xc9   : > { %v243_v62 = vadd.f32 %v242_v59, %v241_v58 }
  0xcb   : > { %v244_v63 = vrot.slane %v243_v62, 1 }
  0xcd   : > { %v245_v2 = vadd.f32 %v244_v63, %v243_v62 }
  0xcf   : > { %405 = vlog2.f32 %v245_v2 }
  0xdc   : > { %v406_v9 = vpop.eup %405 }
  0xdd   : > { %v247_v12 = vmul.f32 0.6931472, %v406_v9 }
  0xdf   : > { %v248_v13 = vadd.f32 %v247_v12, %v560_v27 }
  0xe1   : > { %v272_v15 = vsub.f32 %v248_v13, %v271_v14 }
  0xe3   : > { %273 = vst [vmem:[%s147_s3] sm:$0x1] %v272_v15 }
  0xe4   : > { %420 = shalt.err (!%p417_p4)
}
  0xe5   : > { %s421_s22 = scalar_lea.hbm %s285_s7, 16  ;;  %s425_s24 = scalar_lea.hbm %s610_s2, 32 }
  0xe6   : > { %p422_p7 = scmp.ne.s32.totalorder %s285_s7, %s421_s22  ;;  %p426_p10 = scmp.lt.s32.totalorder %s285_s7, %s610_s2 }
  0xe7   : > { %p427_p11 = scmp.lt.s32.totalorder %s425_s24, %s421_s22 }
  0xe8   : > { %p423_p8 = pnand %p422_p7, %p523_p5 }
  0xe9   : > { %p428_p12 = por %p427_p11, %p426_p10 }
  0xea   : > { %p424_p9 = pneg %p423_p8 }
  0xec   : > { %p429_p13 = pnand %p428_p12, %p424_p9 }
  0xee   : > { %432 = shalt.err (!%p429_p13)
}
  0xef   : > { %360 = dma.vmem_to_hbm [thread:$0]  (%p523_p5), %s288_s4, 16, %s285_s7, %s275_s8  }
  0xf0 PF: > { %p366_p0 = scmp.ge.s32.totalorder %s467_s12, 2  ;;  %s299_s27 = sand.u32 1, %s455_s9  }
  0xf1   : > { %s300_s28 = scalar_lea.sflag [#allocation3], %s299_s27 }
  0xf2   : > { %p363_p1 = pnand %p366_p0, %p527_p6 }
  0xf4   : > { %p364_p2 = pneg %p363_p1 }
  0xf6   : > { %450 = dma.done.wait (%p364_p2), %s300_s28, 16  }
  0xf7   : > { %452 = vsyncadd (%p364_p2), %s300_s28, 4294967280  ;;  %p12_p3 = scmp.ge.s32.totalorder %s510_s15, 4   ;;  %s613_s9 = smov %s459_s10 }
  0xf8   : > { %s614_s10 = smov %s463_s11  ;;  %s615_s11 = smov %s521_s18 }
  0xf9   : > { %s616_s12 = smov %s510_s15  ;;  %14 = sbr.rel (!%p12_p3) target bundleno = 3 (0x3), region = 66 }
  0xfe   :  { %304 = vsyncpa [#allocation3], 1 }
  0xff   :  { %306 = vsyncpa [#allocation3 + $0x1], 1 }

// kernel: tpu_custom_call.1
= control target key start
LH: loop header
LB: loop body
LE: loop exit
PB: predicated region body
PF: predicated region fallthrough
CT: control target
= control target key end

     0   :  { %v16_v0 = vlaneseq  ;;  %s183_s0 = inlined_call_operand.vmem [shape: f32[22,16], index: 0, kind: input, shape index: {}]   ;;  %s184_s1 = inlined_call_operand.vmem [shape: s32[1,16], index: 1, kind: input, shape index: {}]   ;;  %s185_s2 = inlined_call_operand.hbm [shape: f32[1,128], index: 2, kind: output, shape index: {}]  }
   0x1   :  { %v12_v1 = vld [vmem:[%s183_s0] sm:$0xff]  ;;  %v13_v2 = vld [vmem:[%s183_s0 + $0x8] sm:$0xff]  ;;  %v14_v3 = vld [vmem:[%s183_s0 + $0x10] sm:$0x3f] }
   0x2   :  { %v17_v4 = vshrl.u32 %v16_v0, 7 }
   0x3   :  { %7 = vsyncpa [#allocation3], 0  ;;  %v166_v5 = vld [vmem:[%s184_s1] sm:$0x1]  ;;  %v104_v9 = vadd.f32 -1.0, %v12_v1  ;;  %v105_v10 = vadd.f32 -1.0, %v13_v2 }
   0x4   :  { %v18_v6 = vadd.s32 8, %v17_v4  ;;  %v19_v7 = vadd.s32 16, %v17_v4  ;;  %v23_v8 = vsub.s32 0, %v17_v4  ;;  %v106_v11 = vadd.f32 -1.0, %v14_v3  ;;  %s138_s0 = smov [#allocation2]  }
   0x5   :  { %vm34_vm0 = vcmask 1045504   ;;  %vm20_vm4 = vcmp.ge.s32.totalorder %v166_v5, 0  ;;  %s96_s1 = sshll.u32 %s138_s0, 4  ;;  %s97_s1 = int_to_ptr.vmem [resolvable:$true] %s96_s1 }
   0x6   :  { %v24_v12 = vrot.slane %v166_v5, %v23_v8  ;;  %s116_s17 = scalar_lea.vmem %s97_s1, 16  ;;  %s120_s18 = scalar_lea.vmem %s97_s1, 32 }
   0x7   :  { %p117_p0 = scmp.ne.s32.totalorder %s97_s1, %s116_s17  ;;  %p121_p1 = scmp.lt.s32.totalorder %s97_s1, %s97_s1 }
   0x8   :  { %vm25_vm1 = vcmp.eq.s32.totalorder %v17_v4, %v24_v12  ;;  %vm26_vm2 = vcmp.eq.s32.totalorder %v18_v6, %v24_v12  ;;  %vm27_vm3 = vcmp.eq.s32.totalorder %v19_v7, %v24_v12  ;;  %p122_p2 = scmp.lt.s32.totalorder %s120_s18, %s116_s17 }
   0x9   :  { %v31_v13 = vsel %vm25_vm1, %v104_v9, %v12_v1  ;;  %v32_v14 = vsel %vm26_vm2, %v105_v10, %v13_v2  ;;  %v33_v15 = vsel %vm27_vm3, %v106_v11, %v14_v3  ;;  %v65_v32 = vsel %vm25_vm1, %v104_v9, 0.0 }
   0xa   :  { %v35_v16 = vsel %vm34_vm0, %v33_v15, -inf  ;;  %v36_v17 = vmax.f32 %v31_v13, %v32_v14  ;;  %v77_v31 = vadd.f32 %v32_v14, %v31_v13  ;;  %v66_v33 = vsel %vm26_vm2, %v105_v10, 0.0  ;;  %p123_p3 = por %p122_p2, %p121_p1 }
   0xb   :  { %v78_v34 = vsel %vm34_vm0, %v33_v15, 0.0  ;;  %v67_v35 = vsel %vm27_vm3, %v106_v11, 0.0  ;;  %v68_v38 = vadd.f32 %v66_v33, %v65_v32 }
   0xc   :  { %v37_v18 = vmax.f32 %v36_v17, %v35_v16  ;;  %v79_v39 = vadd.f32 %v78_v34, %v77_v31  ;;  %v69_v42 = vsel %vm34_vm0, %v67_v35, 0.0  ;;  %p124_p4 = pnand %p123_p3, %p117_p0 }
   0xd   :  { %v70_v45 = vadd.f32 %v69_v42, %v68_v38 }
   0xe   :  { %v38_v19 = vrot.slane %v37_v18, 4  ;;  %v80_v46 = vrot.slane %v79_v39, 4 }
   0xf   :  { %v71_v49 = vrot.slane %v70_v45, 4 }
  0x10   :  { %v39_v20 = vmax.f32 %v37_v18, %v38_v19  ;;  %v81_v50 = vadd.f32 %v80_v46, %v79_v39 }
  0x11   :  { %v72_v53 = vadd.f32 %v71_v49, %v70_v45 }
  0x12   :  { %v40_v21 = vrot.slane %v39_v20, 2  ;;  %v82_v54 = vrot.slane %v81_v50, 2 }
  0x13   :  { %v73_v57 = vrot.slane %v72_v53, 2 }
  0x14   :  { %v41_v22 = vmax.f32 %v39_v20, %v40_v21  ;;  %v83_v58 = vadd.f32 %v82_v54, %v81_v50 }
  0x15   :  { %v74_v59 = vadd.f32 %v73_v57, %v72_v53 }
  0x16   :  { %v42_v23 = vrot.slane %v41_v22, 1  ;;  %v84_v60 = vrot.slane %v83_v58, 1 }
  0x17   :  { %v75_v61 = vrot.slane %v74_v59, 1 }
  0x18   :  { %v43_v24 = vmax.f32 %v41_v22, %v42_v23  ;;  %v85_v62 = vadd.f32 %v84_v60, %v83_v58 }
  0x19   :  { %v76_v63 = vadd.f32 %v75_v61, %v74_v59 }
  0x1a   :  { %v44_v25 = vsub.f32 %v31_v13, %v43_v24  ;;  %v45_v26 = vsub.f32 %v32_v14, %v43_v24  ;;  %v46_v27 = vsub.f32 %v33_v15, %v43_v24  ;;  %v86_v0 = vmul.f32 0.045454547, %v85_v62 }
  0x1c   :  { %v47_v28 = vmul.f32 1.442695, %v44_v25  ;;  %v49_v29 = vmul.f32 1.442695, %v45_v26  ;;  %v51_v30 = vmul.f32 1.442695, %v46_v27  ;;  %v87_v3 = vsel %vm20_vm4, %v76_v63, %v86_v0 }
  0x1e   :  { %108 = vpow2.f32 %v47_v28 }
  0x1f   :  { %110 = vpow2.f32 %v49_v29 }
  0x20   :  { %112 = vpow2.f32 %v51_v30 }
  0x2b   :  { %v109_v36 = vpop.eup %108 }
  0x2c   :  { %v111_v37 = vpop.eup %110 }
  0x2d   :  { %v113_v40 = vpop.eup %112  ;;  %v53_v41 = vadd.f32 %v111_v37, %v109_v36 }
  0x2e   :  { %v54_v43 = vsel %vm34_vm0, %v113_v40, 0.0 }
  0x2f   :  { %v55_v44 = vadd.f32 %v54_v43, %v53_v41 }
  0x31   :  { %v56_v47 = vrot.slane %v55_v44, 4 }
  0x33   :  { %v57_v48 = vadd.f32 %v56_v47, %v55_v44 }
  0x35   :  { %v58_v51 = vrot.slane %v57_v48, 2 }
  0x37   :  { %v59_v52 = vadd.f32 %v58_v51, %v57_v48 }
  0x39   :  { %v60_v55 = vrot.slane %v59_v52, 1 }
  0x3b   :  { %v61_v56 = vadd.f32 %v60_v55, %v59_v52 }
  0x3d   :  { %114 = vlog2.f32 %v61_v56 }
  0x4a   :  { %v115_v1 = vpop.eup %114 }
  0x4b   :  { %v63_v2 = vmul.f32 0.6931472, %v115_v1 }
  0x4d   :  { %v64_v4 = vadd.f32 %v63_v2, %v43_v24 }
  0x4f   :  { %v88_v6 = vsub.f32 %v64_v4, %v87_v3 }
  0x51   :  { %89 = vst [vmem:[#allocation2] sm:$0x1] %v88_v6 }
  0x52   :  { %127 = shalt.err (!%p124_p4)
}
  0x53   :  { %99 = dma.vmem_to_hbm [thread:$0]  %s97_s1, 16, %s185_s2, [#allocation3]  }
  0x54   :  { %136 = dma.done.wait [#allocation3], 16  }
  0x55   :  { %137 = vsyncadd [#allocation3], 4294967280 }
  0x56   :  { %103 = vsyncpa [#allocation3], 1 }

</bundles_post_ra>
